<compile_context>
chip_gen: v6e
topology: v6e:2x2x1
jax: 0.10.0
libtpu: 0.0.40
codegen_flags: <defaults>
</compile_context>

<pallas_src>
import functools

import jax
import jax.numpy as jnp
from jax.experimental import pallas as pl
from jax.experimental.pallas import tpu as pltpu

_LANES = 128


def _mul_kernel(x_ref, o_ref, *, k):
    # Pure VPU elementwise multiply on the whole VMEM tile.
    o_ref[...] = (x_ref[...] * k).astype(o_ref.dtype)


def _round_up(x: int, m: int) -> int:
    return ((x + m - 1) // m) * m


@functools.partial(jax.jit, static_argnames=("k",))
def mul(t: jax.Array, k) -> jax.Array:
    """Elementwise t * k via a Pallas TPU kernel (PyTorch torch.mul(t, k))."""
    orig_shape = t.shape
    in_dtype = t.dtype
    # PyTorch-like promotion: float tensor keeps its dtype; int tensor * float
    # scalar promotes to float.
    out_dtype = jnp.result_type(in_dtype, k)

    n = t.size
    if n == 0:
        return jnp.zeros(orig_shape, out_dtype)

    itemsize = jnp.dtype(in_dtype).itemsize
    sublane = max(8, 32 // itemsize)  # 8 for f32, 16 for bf16, 32 for int8/fp8

    # ~2 MiB per input tile (multiple of the sublane packing granularity).
    target_tile_bytes = 2 * 1024 * 1024
    tile_rows_cap = max(
        sublane,
        (target_tile_bytes // (_LANES * itemsize)) // sublane * sublane,
    )

    rows = pl.cdiv(n, _LANES)

    if n % _LANES == 0:
        # Fast path: free reshape, no extra HBM traffic.
        rows_p = rows
        x2d = t.reshape(rows_p, _LANES)
        padded = False
    else:
        # Slow path: flat size not a multiple of 128 lanes -> pad once.
        rows_p = _round_up(rows, sublane)
        flat = jnp.zeros((rows_p * _LANES,), dtype=in_dtype).at[:n].set(t.reshape(-1))
        x2d = flat.reshape(rows_p, _LANES)
        padded = True

    if rows_p <= tile_rows_cap:
        tile_rows = rows_p            # single block == full array (always legal)
        grid = (1,)
    else:
        tile_rows = tile_rows_cap     # large fixed tile; Pallas masks the ragged tail
        grid = (pl.cdiv(rows_p, tile_rows),)

    out2d = pl.pallas_call(
        functools.partial(_mul_kernel, k=k),
        out_shape=jax.ShapeDtypeStruct((rows_p, _LANES), out_dtype),
        grid_spec=pltpu.PrefetchScalarGridSpec(
            num_scalar_prefetch=0,
            grid=grid,
            in_specs=[pl.BlockSpec((tile_rows, _LANES), lambda i: (i, 0))],
            out_specs=pl.BlockSpec((tile_rows, _LANES), lambda i: (i, 0)),
        ),
        compiler_params=pltpu.CompilerParams(
            dimension_semantics=("parallel",)),
    )(x2d)

    if padded:
        return out2d.reshape(-1)[:n].reshape(orig_shape)
    return out2d.reshape(orig_shape)


if __name__ == "__main__":
    key = jax.random.PRNGKey(0)
    k = 2.5  # the module's scalar constant

    # Main case: small NCHW tensor, size divisible by 128 -> zero-copy fast path.
    x = jax.random.normal(key, (2, 4, 16, 16), dtype=jnp.float32)
    y = jax.block_until_ready(mul(x, k))
    ref = x * k
    assert y.shape == x.shape and y.dtype == ref.dtype
    assert jnp.allclose(y, ref, atol=1e-6, rtol=1e-6)

    # Ragged case: size not a multiple of 128 -> exercises the pad path.
    x2 = jax.random.normal(jax.random.PRNGKey(1), (3, 5, 7), dtype=jnp.float32)
    y2 = jax.block_until_ready(mul(x2, k))
    ref2 = x2 * k
    assert y2.shape == x2.shape and y2.dtype == ref2.dtype
    assert jnp.allclose(y2, ref2, atol=1e-6, rtol=1e-6)

    print("KERNEL_OK")
</pallas_src>

<mosaic_0001>
module attributes {stable_mosaic.version = 11 : i64} {
  func.func @_mul_kernel(%arg0: i32, %arg1: memref<16x128xf32, #tpu.memory_space<vmem>>, %arg2: memref<16x128xf32, #tpu.memory_space<vmem>>) attributes {dimension_semantics = [#tpu.dimension_semantics<parallel>], iteration_bounds = array<i64: 1>, scalar_prefetch = 0 : i64, scratch_operands = 0 : i64, tpu.core_type = #tpu.core_type<tc>, window_params = [{transform_indices = @transform_0, window_bounds = array<i64: 16, 128>}, {transform_indices = @transform_1, window_bounds = array<i64: 16, 128>}]} {
    %c0 = arith.constant 0 : index
    %c0_0 = arith.constant 0 : index
    %0 = vector.load %arg1[%c0, %c0_0] : memref<16x128xf32, #tpu.memory_space<vmem>>, vector<16x128xf32>
    %cst = arith.constant 2.500000e+00 : f32
    %1 = vector.broadcast %cst : f32 to vector<16x128xf32>
    %2 = arith.mulf %0, %1 : vector<16x128xf32>
    %c0_1 = arith.constant 0 : index
    %c0_2 = arith.constant 0 : index
    %3 = vector.load %arg2[%c0_1, %c0_2] : memref<16x128xf32, #tpu.memory_space<vmem>>, vector<16x128xf32>
    tpu.vector_store %arg2[%c0_1, %c0_2], %2 {strides = array<i32>} : memref<16x128xf32, #tpu.memory_space<vmem>>, vector<16x128xf32>,
    return
  }
  func.func @transform_0(%arg0: i32) -> (i32, i32) {
    %c0_i32 = arith.constant 0 : i32
    %c0_i32_0 = arith.constant 0 : i32
    return %arg0, %c0_i32 : i32, i32
  }
  func.func @transform_1(%arg0: i32) -> (i32, i32) {
    %c0_i32 = arith.constant 0 : i32
    %c0_i32_0 = arith.constant 0 : i32
    return %arg0, %c0_i32 : i32, i32
  }
}

</mosaic_0001>

<bundles_post_ra>
// kernel: mul.1
= control target key start
LH: loop header
LB: loop body
LE: loop exit
PB: predicated region body
PF: predicated region fallthrough
CT: control target
= control target key end

     0   :  { %s40_s0 = inlined_call_operand.vmem [shape: f32[16,128], index: 0, kind: input, shape index: {}]   ;;  %s41_s1 = inlined_call_operand.vmem [shape: f32[16,128], index: 1, kind: output, shape index: {}]  }
   0x1   :  { %v8_v0 = vld [vmem:[%s40_s0] sm:$0xff]  ;;  %v9_v1 = vld [vmem:[%s40_s0 + $0x8] sm:$0xff] }
   0x2   :  { %v10_v2 = vmul.f32 2.5, %v8_v0  ;;  %v11_v3 = vmul.f32 2.5, %v9_v1 }
   0x4   :  { %12 = vst [vmem:[%s41_s1] sm:$0xff] %v10_v2  ;;  %13 = vst [vmem:[%s41_s1 + $0x8] sm:$0xff] %v11_v3 }

</bundles_post_ra>
